<compile_context>
chip_gen: v6e
topology: v6e:2x2x1
jax: 0.10.0
libtpu: 0.0.40
codegen_flags: <defaults>
</compile_context>

<pallas_src>
import jax
import jax.numpy as jnp
from jax.experimental import pallas as pl
from jax.experimental.pallas import tpu as pltpu


# ----------------------------- Pallas kernel ------------------------------ #
def _sparse_tsf_kernel(a_ref, x_ref, o_ref):
    # a_ref: (pred_len, S)  folded weight matrix (resident in VMEM, f32)
    # x_ref: (S, tn)        time in sublanes, (batch*)channel in lanes
    # o_ref: (pred_len, tn)
    x = x_ref[...].astype(jnp.float32)                     # (S, tn)
    seq_mean = jnp.mean(x, axis=0, keepdims=True)          # (1, tn), f32
    xc = x - seq_mean                                      # (S, tn)
    # conv1d + residual + period-wise linear, all as one MXU contraction
    y = jnp.dot(a_ref[...], xc, preferred_element_type=jnp.float32)
    o_ref[...] = (y + seq_mean).astype(o_ref.dtype)


# ------------------------- host-side weight folding ------------------------ #
def _fold_weights(conv_w, lin_w, period_len, seq_len):
    """A = kron(W, I_P) @ (band(conv_w) + I), shape (pred_len, seq_len), f32.

    band(conv_w)[t, s] = conv_w[s - t + pad]  (cross-correlation, zero 'same'
    padding, no bias) — identical to nn.Conv1d(1, 1, K, padding=K//2).
    """
    conv_w = conv_w.astype(jnp.float32)
    lin_w = lin_w.astype(jnp.float32)
    K = conv_w.shape[0]
    pad = K // 2
    S = seq_len
    t = jnp.arange(S)[:, None]
    s = jnp.arange(S)[None, :]
    idx = s - t + pad
    band = jnp.where((idx >= 0) & (idx < K),
                     conv_w[jnp.clip(idx, 0, K - 1)], 0.0)
    conv_res = band + jnp.eye(S, dtype=jnp.float32)                    # conv + residual
    expand = jnp.kron(lin_w, jnp.eye(period_len, dtype=jnp.float32))   # (pred_len, S)
    return expand @ conv_res


def _pick_lane_tile(C, cap):
    """Largest multiple-of-128 divisor of C that is <= cap (None if none)."""
    best = None
    d = 128
    limit = min(C, max(int(cap), 128))
    while d <= limit:
        if C % d == 0:
            best = d
        d += 128
    return best


# ------------------------------ wrapper ----------------------------------- #
def sparse_tsf_forward(x_enc, conv_w, lin_w, period_len, *,
                       lane_tile=512, vmem_limit_bytes=None):
    """x_enc: (B, seq_len, enc_in); conv_w: (K,); lin_w: (seg_num_y, seg_num_x).

    lane_tile=512 is safe on all of v5e/v6e/v7x with default scoped VMEM even
    for S = pred_len = 720; raise to 1024-2048 on v6e together with
    vmem_limit_bytes for slightly better HBM efficiency.
    """
    B, S, C = x_enc.shape
    seg_y, seg_x = lin_w.shape
    assert seg_x * period_len == S, "lin_w in_features must be seq_len // period_len"
    pred_len = seg_y * period_len

    A = _fold_weights(conv_w, lin_w, period_len, S)        # (pred_len, S) f32

    # ------------- wide-channel path: no host relayout at all ------------- #
    if C >= 128:
        ct = _pick_lane_tile(C, lane_tile)
        if ct is None:
            ct = C                                          # full-dim block (legal)
        grid = (B, C // ct)
        return pl.pallas_call(
            _sparse_tsf_kernel,
            out_shape=jax.ShapeDtypeStruct((B, pred_len, C), x_enc.dtype),
            grid=grid,
            in_specs=[
                pl.BlockSpec((pred_len, S), lambda b, c: (0, 0)),          # resident A
                pl.BlockSpec((pl.Squeezed(), S, ct), lambda b, c: (b, 0, c)),
            ],
            out_specs=pl.BlockSpec((pl.Squeezed(), pred_len, ct),
                                   lambda b, c: (b, 0, c)),
            compiler_params=pltpu.CompilerParams(
                dimension_semantics=("parallel", "parallel"),
                vmem_limit_bytes=vmem_limit_bytes),
        )(A, x_enc)

    # ------------- small-channel path: fuse batch*channel into lanes ------ #
    N = B * C
    LANE = 128
    n_ceil = pl.cdiv(N, LANE) * LANE
    tn = max(LANE, (min(int(lane_tile), n_ceil) // LANE) * LANE)
    # prefer >= 2 grid steps when possible so both v7x TensorCores get work
    if n_ceil // tn < 2 and n_ceil >= 2 * LANE:
        tn = max(LANE, (n_ceil // 2) // LANE * LANE)
    n_pad = pl.cdiv(N, tn) * tn

    # lane-dense layout: time in sublanes, fused batch*channel in lanes
    x2 = jnp.transpose(x_enc, (1, 0, 2)).reshape(S, N)
    if n_pad != N:
        x2 = jnp.pad(x2, ((0, 0), (0, n_pad - N)))

    out2 = pl.pallas_call(
        _sparse_tsf_kernel,
        out_shape=jax.ShapeDtypeStruct((pred_len, n_pad), x_enc.dtype),
        grid=(n_pad // tn,),
        in_specs=[
            pl.BlockSpec((pred_len, S), lambda n: (0, 0)),                 # resident A
            pl.BlockSpec((S, tn), lambda n: (0, n)),
        ],
        out_specs=pl.BlockSpec((pred_len, tn), lambda n: (0, n)),
        compiler_params=pltpu.CompilerParams(
            dimension_semantics=("parallel",),
            vmem_limit_bytes=vmem_limit_bytes),
    )(A, x2)

    out = out2[:, :N].reshape(pred_len, B, C)
    return jnp.transpose(out, (1, 0, 2))                   # (B, pred_len, C)


# --------------------- pure-JAX reference (PyTorch mirror) ----------------- #
def reference_forward(x, conv_w, lin_w, period_len):
    B, S, C = x.shape
    K = conv_w.shape[0]
    pad = K // 2
    seg_x = S // period_len
    seg_y = lin_w.shape[0]
    mean = jnp.mean(x, axis=1, keepdims=True)                    # (B, 1, C)
    xc = jnp.transpose(x - mean, (0, 2, 1))                      # (B, C, S)
    xr = xc.reshape(B * C, S)
    xp = jnp.pad(xr, ((0, 0), (pad, pad)))
    conv = sum(conv_w[k] * xp[:, k:k + S] for k in range(K))     # cross-correlation
    z = conv.reshape(B, C, S) + xc
    u = z.reshape(B * C, seg_x, period_len).transpose(0, 2, 1)   # (BC, P, seg_x)
    y = u @ lin_w.T                                              # (BC, P, seg_y)
    y = y.transpose(0, 2, 1).reshape(B, C, seg_y * period_len)
    return jnp.transpose(y, (0, 2, 1)) + mean


# ----------------------------------- main ---------------------------------- #
if __name__ == "__main__":
    # configs: task_name='long_term_forecast', seq_len=16, pred_len=8,
    #          period_len=4 -> seg_num_x=4, seg_num_y=2, K=5
    seq_len, pred_len, period_len = 16, 8, 4
    seg_num_x = seq_len // period_len
    seg_num_y = pred_len // period_len
    ksize = 1 + 2 * (period_len // 2)

    key = jax.random.PRNGKey(0)
    kx1, kx2, kc, kl = jax.random.split(key, 4)
    conv_w = 0.2 * jax.random.normal(kc, (ksize,), dtype=jnp.float32)           # Conv1d (1,1,K) squeezed
    lin_w = 0.2 * jax.random.normal(kl, (seg_num_y, seg_num_x), dtype=jnp.float32)  # Linear (out, in)

    # --- test 1: small channel count -> fused (S, B*C) lane path ---------- #
    B1, C1 = 2, 4
    x1 = jax.random.normal(kx1, (B1, seq_len, C1), dtype=jnp.float32)
    out1 = jax.block_until_ready(sparse_tsf_forward(x1, conv_w, lin_w, period_len))
    ref1 = reference_forward(x1, conv_w, lin_w, period_len)
    assert out1.shape == (B1, pred_len, C1)
    assert jnp.allclose(out1, ref1, atol=1e-5, rtol=1e-5), "fused-lane path mismatch"

    # --- test 2: wide channel count -> direct (B, S, C) path (no relayout) #
    B2, C2 = 2, 128
    x2 = jax.random.normal(kx2, (B2, seq_len, C2), dtype=jnp.float32)
    out2 = jax.block_until_ready(sparse_tsf_forward(x2, conv_w, lin_w, period_len))
    ref2 = reference_forward(x2, conv_w, lin_w, period_len)
    assert out2.shape == (B2, pred_len, C2)
    assert jnp.allclose(out2, ref2, atol=1e-5, rtol=1e-5), "direct-channel path mismatch"

    print("KERNEL_OK")
</pallas_src>

<mosaic_0001>
module attributes {stable_mosaic.version = 11 : i64} {
  func.func @_sparse_tsf_kernel(%arg0: i32, %arg1: memref<8x16xf32, #tpu.memory_space<vmem>>, %arg2: memref<16x128xf32, #tpu.memory_space<vmem>>, %arg3: memref<8x128xf32, #tpu.memory_space<vmem>>) attributes {dimension_semantics = [#tpu.dimension_semantics<parallel>], iteration_bounds = array<i64: 1>, scalar_prefetch = 0 : i64, scratch_operands = 0 : i64, tpu.core_type = #tpu.core_type<tc>, window_params = [{pipeline_mode = #tpu.pipeline_mode<synchronous>, transform_indices = @transform_0, window_bounds = array<i64: 8, 16>}, {transform_indices = @transform_1, window_bounds = array<i64: 16, 128>}, {transform_indices = @transform_2, window_bounds = array<i64: 8, 128>}]} {
    %c0 = arith.constant 0 : index
    %c0_0 = arith.constant 0 : index
    %0 = vector.load %arg2[%c0, %c0_0] : memref<16x128xf32, #tpu.memory_space<vmem>>, vector<16x128xf32>
    %cst = arith.constant dense<0.000000e+00> : vector<128xf32>
    %1 = vector.multi_reduction <add>, %0, %cst [0] : vector<16x128xf32> to vector<128xf32>
    %2 = vector.shape_cast %1 : vector<128xf32> to vector<1x128xf32>
    %cst_1 = arith.constant 1.600000e+01 : f32
    %3 = vector.broadcast %cst_1 : f32 to vector<1x128xf32>
    %4 = arith.divf %2, %3 : vector<1x128xf32>
    %5 = vector.broadcast %4 : vector<1x128xf32> to vector<16x128xf32>
    %6 = arith.subf %0, %5 : vector<16x128xf32>
    %c0_2 = arith.constant 0 : index
    %c0_3 = arith.constant 0 : index
    %7 = vector.load %arg1[%c0_2, %c0_3] : memref<8x16xf32, #tpu.memory_space<vmem>>, vector<8x16xf32>
    %cst_4 = arith.constant dense<0.000000e+00> : vector<8x128xf32>
    %8 = tpu.matmul %7, %6, %cst_4 {dimension_numbers = #tpu.dot_dimension_numbers<[1], [0], [0], [1], [0, 0, 1, 1], [], []>} : vector<8x16xf32>, vector<16x128xf32>, vector<8x128xf32> -> vector<8x128xf32>
    %9 = vector.broadcast %4 : vector<1x128xf32> to vector<8x128xf32>
    %10 = arith.addf %8, %9 : vector<8x128xf32>
    %c0_5 = arith.constant 0 : index
    %c0_6 = arith.constant 0 : index
    %11 = vector.load %arg3[%c0_5, %c0_6] : memref<8x128xf32, #tpu.memory_space<vmem>>, vector<8x128xf32>
    tpu.vector_store %arg3[%c0_5, %c0_6], %10 {strides = array<i32>} : memref<8x128xf32, #tpu.memory_space<vmem>>, vector<8x128xf32>,
    return
  }
  func.func @transform_0(%arg0: i32) -> (i32, i32) {
    %c0_i32 = arith.constant 0 : i32
    %c0_i32_0 = arith.constant 0 : i32
    %c0_i32_1 = arith.constant 0 : i32
    return %c0_i32, %c0_i32_0 : i32, i32
  }
  func.func @transform_1(%arg0: i32) -> (i32, i32) {
    %c0_i32 = arith.constant 0 : i32
    %c0_i32_0 = arith.constant 0 : i32
    return %c0_i32, %arg0 : i32, i32
  }
  func.func @transform_2(%arg0: i32) -> (i32, i32) {
    %c0_i32 = arith.constant 0 : i32
    %c0_i32_0 = arith.constant 0 : i32
    return %c0_i32, %arg0 : i32, i32
  }
}

</mosaic_0001>

<bundles_post_ra>
// kernel: tpu_custom_call.1
= control target key start
LH: loop header
LB: loop body
LE: loop exit
PB: predicated region body
PF: predicated region fallthrough
CT: control target
= control target key end

     0   :  { %7 = vsyncpa [#allocation3], 0  ;;  %s258_s0 = inlined_call_operand.hbm [shape: f32[8,16], index: 0, kind: input, shape index: {}]   ;;  %s259_s1 = inlined_call_operand.hbm [shape: f32[16,128], index: 1, kind: input, shape index: {}]   ;;  %s260_s2 = inlined_call_operand.hbm [shape: f32[8,128], index: 2, kind: output, shape index: {}]  }
   0x1   :  { %8 = vsyncpa [#allocation6], 0 }
   0x2   :  { %9 = vsyncpa [#allocation4], 0  ;;  %s227_s9 = smov [#allocation2]   ;;  %s228_s11 = smov [#allocation5]  }
   0x3   :  { %s16_s10 = sshll.u32 %s227_s9, 4  ;;  %s25_s12 = sshll.u32 %s228_s11, 4  ;;  %s17_s10 = int_to_ptr.vmem [resolvable:$true] %s16_s10  ;;  %s26_s12 = int_to_ptr.vmem [resolvable:$true] %s25_s12 }
   0x4   :  { %s169_s13 = scalar_lea.vmem %s17_s10, 128  ;;  %p174_p1 = scmp.lt.s32.totalorder %s17_s10, %s17_s10 }
   0x5   :  { %p170_p0 = scmp.ne.s32.totalorder %s17_s10, %s169_s13  ;;  %p175_p2 = scmp.lt.s32.totalorder %s169_s13, %s169_s13 }
   0x7   :  { %p176_p3 = por %p175_p2, %p174_p1 }
   0x9   :  { %p177_p4 = pnand %p176_p3, %p170_p0 }
   0xb   :  { %180 = shalt.err (!%p177_p4)
}
   0xc   :  { %19 = dma.hbm_to_vmem [thread:$0]  %s258_s0, 128, %s17_s10, [#allocation3]  }
   0xd   :  { %s189_s16 = scalar_lea.vmem %s26_s12, 256  ;;  %p194_p6 = scmp.lt.s32.totalorder %s26_s12, %s26_s12 }
   0xe   :  { %p190_p5 = scmp.ne.s32.totalorder %s26_s12, %s189_s16  ;;  %p195_p7 = scmp.lt.s32.totalorder %s189_s16, %s189_s16 }
  0x10   :  { %p196_p8 = por %p195_p7, %p194_p6 }
  0x12   :  { %p197_p9 = pnand %p196_p8, %p190_p5 }
  0x14   :  { %200 = shalt.err (!%p197_p9)
}
  0x15   :  { %s229_s17 = smov 128   ;;  %s230_s18 = smov 8  }
  0x16   :  { %31 = dma.hbm_to_vmem [thread:$0]  %s259_s1, 256, %s26_s12, [#allocation6], %s229_s17, %s229_s17, %s230_s18  }
  0x17   :  { %221 = dma.done.wait [#allocation3], 128  }
  0x18   :  { %222 = vsyncadd [#allocation3], 4294967168 }
  0x19   :  { %223 = dma.done.wait [#allocation6], 256  }
  0x1a   :  { %224 = vsyncadd [#allocation6], 4294967040  ;;  %v231_v0 = vmov 0.0   ;;  %vm232_vm0 = vmmov 0   ;;  %v38_v1 = vld [vmem:[#allocation5] sm:$0xff]  ;;  %v39_v2 = vld [vmem:[#allocation5 + $0x8] sm:$0xff] }
  0x1b   :  { %147 = vmatprep.subr.mxu0 %v231_v0  ;;  %151 = vmatprep.mubr.msk.f32.mxu0 %vm232_vm0, %v231_v0  ;;  %v40_v3 = vadd.f32 %v39_v2, %v38_v1  ;;  %v51_v13 = vld [vmem:[#allocation2] sm:$0xff]  ;;  %vm52_vm1 = vcmask 130048   ;;  %s233_s0 = smov [#allocation7]  }
  0x1c   :  { %s133_s1 = sshll.u32 %s233_s0, 4  ;;  %s134_s1 = int_to_ptr.vmem [resolvable:$true] %s133_s1 }
  0x1d   :  { %v41_v4 = vrot.slane %v40_v3, 4  ;;  %s201_s21 = scalar_lea.vmem %s134_s1, 128  ;;  %p206_p11 = scmp.lt.s32.totalorder %s134_s1, %s134_s1 }
  0x1e   :  { %p202_p10 = scmp.ne.s32.totalorder %s134_s1, %s201_s21  ;;  %p207_p12 = scmp.lt.s32.totalorder %s201_s21, %s201_s21 }
  0x1f   :  { %v42_v5 = vadd.f32 %v41_v4, %v40_v3 }
  0x20   :  { %p208_p13 = por %p207_p12, %p206_p11 }
  0x21   :  { %v43_v6 = vrot.slane %v42_v5, 2 }
  0x22   :  { %p209_p0 = pnand %p208_p13, %p202_p10 }
  0x23   :  { %v44_v7 = vadd.f32 %v43_v6, %v42_v5 }
  0x25   :  { %v45_v8 = vrot.slane %v44_v7, 1 }
  0x27   :  { %v46_v9 = vadd.f32 %v45_v8, %v44_v7 }
  0x29   :  { %v48_v10 = vmul.f32 0.0625, %v46_v9 }
  0x2b   :  { %v50_v11 = vsub.f32 %v39_v2, %v48_v10  ;;  %v49_v12 = vsub.f32 %v38_v1, %v48_v10 }
  0x2d   :  { %148 = vmatpush3.msra.mxu0 %v50_v11 }
  0x2e   :  { %149 = vmatprep.subr.mxu0 %v231_v0 }
  0x2f   :  { %150 = vmatpush3.msra.mxu0 %v49_v12 }
  0x30   :  { %152 = vmatmul.mubr.msk.f32.vlgmr.msra.gmra.mxu0 %vm52_vm1, %v51_v13 }
  0xf0   :  { %v122_v14 = vpop.f32.mrf.mxu0 }
  0xf1   :  { %v123_v15 = vadd.f32 %v122_v14, %v48_v10 }
  0xf2   :  { %v153_v16 = vpop.f32.mrf.mxu0 }
  0xf3   :  { %126 = vst [vmem:[#allocation7] sm:$0xff] %v123_v15 }
  0xf4   :  { %212 = shalt.err (!%p209_p0)
}
  0xf5   :  { %136 = dma.vmem_to_hbm [thread:$0]  %s134_s1, 128, %s260_s2, [#allocation4]  }
  0xf6   :  { %225 = dma.done.wait [#allocation4], 128  }
  0xf7   :  { %226 = vsyncadd [#allocation4], 4294967168 }
  0xf8   :  { %140 = vsyncpa [#allocation3], 1 }
  0xf9   :  { %141 = vsyncpa [#allocation6], 1 }
  0xfa   :  { %142 = vsyncpa [#allocation4], 1 }

</bundles_post_ra>
